<compile_context>
chip_gen: v5e
topology: v5e:2x2
jax: 0.10.0
libtpu: 0.0.40
codegen_flags: <defaults>
</compile_context>

<pallas_src>
import functools

import jax
import jax.numpy as jnp
from jax.experimental import pallas as pl
from jax.experimental.pallas import tpu as pltpu


def _round_up(x, m):
    return ((x + m - 1) // m) * m


def _cdiv(a, b):
    return -(-a // b)


def _bf16_elementwise_ok():
    """bf16 VPU exists on v6e/v7x; v5e has none -> keep elementwise work f32."""
    try:
        kind = jax.devices()[0].device_kind.lower()
    except Exception:
        return True
    return not ("v5e" in kind or "v5 lite" in kind or "v5litepod" in kind)


def _critic_mlp_kernel(sc_ref, idx_ref,
                       w1sc_ref, w1o_ref, b1_ref,
                       w2_ref, b2_ref,
                       w3_ref, b3_ref,
                       w4_ref, b4_ref,
                       o_ref, *, act_dtype):
    """One batch tile.

    sc_ref   : [TILE_B, s_dim+param_dim]  natural-layout [state|cont] slab
    idx_ref  : [1, TILE_B]                int32 discrete-action index row
    w1sc_ref : [H, s_dim+param_dim]       merged W1^T block for (state|cont)
    w1o_ref  : [H, num_disc]              W1^T block for the one-hot
    w2/w3    : [H, H];  w4: [1, H]        transposed weights (mm dtype)
    b*_ref   : [H, 1] ([1, 1] for b4)     float32
    o_ref    : [1, TILE_B]                Q values, lane-dense, float32
    """
    tile_b = idx_ref.shape[1]
    num_disc = w1o_ref.shape[1]
    mm_dtype = w2_ref.dtype

    x = sc_ref[...]                                             # [tb, Fsc]

    # Fused one-hot, built directly in the transposed layout: oh[d, b] = (idx[b]==d).
    d_iota = jax.lax.broadcasted_iota(jnp.int32, (num_disc, tile_b), 0)
    onehot_t = (d_iota == idx_ref[...]).astype(mm_dtype)        # [nd, tb]

    # Layer 1 (two matmuls): W1sc @ x^T (feature-axis contraction keeps the
    # input in natural layout) + W1oh @ onehot_t.  f32 accumulation.
    h = jax.lax.dot_general(w1sc_ref[...], x,
                            dimension_numbers=(((1,), (1,)), ((), ())),
                            preferred_element_type=jnp.float32)
    h = h + jnp.dot(w1o_ref[...], onehot_t,
                    preferred_element_type=jnp.float32)
    h = jnp.maximum(h + b1_ref[...], 0.0).astype(act_dtype)     # [H, tb]

    h = jnp.dot(w2_ref[...], h.astype(mm_dtype),
                preferred_element_type=jnp.float32)
    h = jnp.maximum(h + b2_ref[...], 0.0).astype(act_dtype)

    h = jnp.dot(w3_ref[...], h.astype(mm_dtype),
                preferred_element_type=jnp.float32)
    h = jnp.maximum(h + b3_ref[...], 0.0).astype(act_dtype)

    # Final layer: [1, H] @ [H, tb] -> lane-dense [1, tb] output.
    o_ref[...] = (jnp.dot(w4_ref[...], h.astype(mm_dtype),
                          preferred_element_type=jnp.float32) + b4_ref[...])


def critic_forward(s, a_idx, a_cont, params, num_disc, *,
                   tile_b=4096, use_bf16=True, bf16_activations=None,
                   core_split=False):
    """Pallas-backed Critic.forward.  Returns Q values of shape [B] (float32).

    use_bf16: bf16 MXU operands (helps on v5e/v6e/v7x; accumulation stays f32).
              Note this quantizes the raw state/param inputs to bf16 as well.
    bf16_activations: keep hidden activations bf16 through bias/ReLU
              (auto: True on chips with a bf16 VPU, False on v5e).
    """
    B, s_dim = s.shape
    param_dim = a_cont.shape[1]
    (w1, b1), (w2, b2), (w3, b3), (w4, b4) = params
    in_dim, H = w1.shape
    assert in_dim == s_dim + num_disc + param_dim
    assert tile_b % 128 == 0, "tile_b must be a multiple of 128 (lane width)"

    if bf16_activations is None:
        bf16_activations = use_bf16 and _bf16_elementwise_ok()
    mm_dtype = jnp.bfloat16 if use_bf16 else jnp.float32
    act_dtype = jnp.bfloat16 if (use_bf16 and bf16_activations) else jnp.float32

    # Balanced batch tiling: never exceed tile_b, never leave a near-empty
    # last tile (waste per call bounded by ~steps*127 padded rows).
    steps = _cdiv(max(B, 1), tile_b)
    tb = _round_up(_cdiv(max(B, 1), steps), 128)
    b_pad = steps * tb
    grid = (steps,)

    f_sc = s_dim + param_dim

    # Wrapper-side work is a single fused concat(+cast) and (if needed) a pad:
    # no transpose, no extra HBM round-trip of the full input.
    sc = jnp.concatenate([s, a_cont], axis=-1).astype(mm_dtype)   # [B, f_sc]
    idx = a_idx.astype(jnp.int32)
    if b_pad != B:
        sc = jnp.pad(sc, ((0, b_pad - B), (0, 0)))
        idx = jnp.pad(idx, (0, b_pad - B))
    idx_row = idx[None, :]                                        # [1, b_pad]

    # Pre-transposed weights; W1^T split into merged (state|cont) and one-hot blocks.
    w1t = w1.T                                                    # [H, in_dim]
    w1sc = jnp.concatenate([w1t[:, :s_dim], w1t[:, s_dim + num_disc:]],
                           axis=1).astype(mm_dtype)               # [H, f_sc]
    w1o = w1t[:, s_dim:s_dim + num_disc].astype(mm_dtype)         # [H, nd]
    w2t = w2.T.astype(mm_dtype)
    w3t = w3.T.astype(mm_dtype)
    w4t = w4.T.astype(mm_dtype)                                   # [1, H]
    b1c = b1.astype(jnp.float32)[:, None]                         # [H, 1]
    b2c = b2.astype(jnp.float32)[:, None]
    b3c = b3.astype(jnp.float32)[:, None]
    b4c = b4.astype(jnp.float32)[:, None]                         # [1, 1]

    def stream_rows(shape):     # batch on sublanes (natural input layout)
        return pl.BlockSpec(shape, lambda i: (i, 0))

    def stream_cols(shape):     # batch on lanes (idx row / Q output)
        return pl.BlockSpec(shape, lambda i: (0, i))

    def resident(shape):        # same block every step -> stays in VMEM
        return pl.BlockSpec(shape, lambda i: (0, 0))

    in_specs = [
        stream_rows((tb, f_sc)),
        stream_cols((1, tb)),
        resident((H, f_sc)),
        resident((H, num_disc)),
        resident((H, 1)),
        resident((H, H)),
        resident((H, 1)),
        resident((H, H)),
        resident((H, 1)),
        resident((1, H)),
        resident((1, 1)),
    ]

    mm_bytes = 2 if use_bf16 else 4
    flops = 2 * b_pad * H * (f_sc + num_disc + 2 * H + 1)
    bytes_accessed = (b_pad * f_sc * mm_bytes + b_pad * 4 + b_pad * 4
                      + mm_bytes * (H * f_sc + H * num_disc + 2 * H * H + H)
                      + 4 * (3 * H + 1))

    dim_sem = (pltpu.CORE_PARALLEL,) if core_split else ("parallel",)

    kernel = functools.partial(_critic_mlp_kernel, act_dtype=act_dtype)

    out = pl.pallas_call(
        kernel,
        out_shape=jax.ShapeDtypeStruct((1, b_pad), jnp.float32),
        grid=grid,
        in_specs=in_specs,
        out_specs=pl.BlockSpec((1, tb), lambda i: (0, i)),
        compiler_params=pltpu.CompilerParams(dimension_semantics=dim_sem),
        cost_estimate=pl.CostEstimate(
            flops=flops, transcendentals=0, bytes_accessed=bytes_accessed),
    )(sc, idx_row, w1sc, w1o, b1c, w2t, b2c, w3t, b3c, w4t, b4c)

    return out[0, :B]                                             # squeeze(-1)


def init_linear(key, fan_in, fan_out):
    # Mimic torch.nn.Linear default init: U(-1/sqrt(fan_in), 1/sqrt(fan_in)).
    kw, kb = jax.random.split(key)
    bound = 1.0 / jnp.sqrt(float(fan_in))
    w = jax.random.uniform(kw, (fan_in, fan_out), jnp.float32, -bound, bound)
    b = jax.random.uniform(kb, (fan_out,), jnp.float32, -bound, bound)
    return w, b


def init_critic_params(key, in_dim, hidden=(64, 64, 64), out_dim=1):
    dims = [in_dim, *hidden, out_dim]
    keys = jax.random.split(key, len(dims) - 1)
    return tuple(init_linear(k, dims[i], dims[i + 1]) for i, k in enumerate(keys))


def critic_reference(s, a_idx, a_cont, params, num_disc):
    one_hot = jax.nn.one_hot(a_idx, num_disc, dtype=jnp.float32)
    x = jnp.concatenate([s, one_hot, a_cont], axis=-1)
    (w1, b1), (w2, b2), (w3, b3), (w4, b4) = params
    h = jax.nn.relu(x @ w1 + b1)
    h = jax.nn.relu(h @ w2 + b2)
    h = jax.nn.relu(h @ w3 + b3)
    return (h @ w4 + b4)[:, 0]


if __name__ == "__main__":
    # Small, deterministic example consistent with the module's forward.
    B, s_dim, num_disc, param_dim = 8, 8, 4, 2
    in_dim = s_dim + num_disc + param_dim

    key = jax.random.PRNGKey(0)
    k_s, k_idx, k_cont, k_params, k_s2, k_idx2, k_cont2 = jax.random.split(key, 7)

    s = jax.random.normal(k_s, (B, s_dim), dtype=jnp.float32)
    a_idx = jax.random.randint(k_idx, (B,), 0, num_disc, dtype=jnp.int32)
    a_cont = jax.random.normal(k_cont, (B, param_dim), dtype=jnp.float32)
    params = init_critic_params(k_params, in_dim)
    q_ref = critic_reference(s, a_idx, a_cont, params, num_disc)

    # f32 path (matches the PyTorch module's math; MXU default f32 precision).
    q = jax.block_until_ready(
        critic_forward(s, a_idx, a_cont, params, num_disc, use_bf16=False))
    assert q.shape == (B,)
    assert jnp.allclose(q, q_ref, atol=5e-4, rtol=5e-4)

    # Multi-step grid with balanced tiles + padding, f32.
    B2 = 300
    s2 = jax.random.normal(k_s2, (B2, s_dim), dtype=jnp.float32)
    a_idx2 = jax.random.randint(k_idx2, (B2,), 0, num_disc, dtype=jnp.int32)
    a_cont2 = jax.random.normal(k_cont2, (B2, param_dim), dtype=jnp.float32)
    q2_ref = critic_reference(s2, a_idx2, a_cont2, params, num_disc)
    q2 = jax.block_until_ready(
        critic_forward(s2, a_idx2, a_cont2, params, num_disc,
                       tile_b=128, use_bf16=False))
    assert q2.shape == (B2,)
    assert jnp.allclose(q2, q2_ref, atol=5e-4, rtol=5e-4)

    # Default fast path: bf16 MXU operands (f32 accumulation), bf16 activations
    # auto-enabled on chips with a bf16 VPU.  Loose tolerance (bf16 rounding).
    q_bf = jax.block_until_ready(
        critic_forward(s, a_idx, a_cont, params, num_disc))
    assert jnp.allclose(q_bf, q_ref, atol=1e-1, rtol=1e-1)

    q2_bf = jax.block_until_ready(
        critic_forward(s2, a_idx2, a_cont2, params, num_disc, tile_b=2048))
    assert jnp.allclose(q2_bf, q2_ref, atol=1e-1, rtol=1e-1)

    print("KERNEL_OK")
</pallas_src>

<mosaic_0001>
module attributes {stable_mosaic.version = 11 : i64} {
  func.func @_critic_mlp_kernel(%arg0: i32, %arg1: memref<128x10xf32, #tpu.memory_space<vmem>>, %arg2: memref<1x128xi32, #tpu.memory_space<vmem>>, %arg3: memref<64x10xf32, #tpu.memory_space<vmem>>, %arg4: memref<64x4xf32, #tpu.memory_space<vmem>>, %arg5: memref<64x1xf32, #tpu.memory_space<vmem>>, %arg6: memref<64x64xf32, #tpu.memory_space<vmem>>, %arg7: memref<64x1xf32, #tpu.memory_space<vmem>>, %arg8: memref<64x64xf32, #tpu.memory_space<vmem>>, %arg9: memref<64x1xf32, #tpu.memory_space<vmem>>, %arg10: memref<1x64xf32, #tpu.memory_space<vmem>>, %arg11: memref<1x1xf32, #tpu.memory_space<vmem>>, %arg12: memref<1x128xf32, #tpu.memory_space<vmem>>) attributes {dimension_semantics = [#tpu.dimension_semantics<parallel>], iteration_bounds = array<i64: 1>, scalar_prefetch = 0 : i64, scratch_operands = 0 : i64, tpu.core_type = #tpu.core_type<tc>, window_params = [{transform_indices = @transform_0, window_bounds = array<i64: 128, 10>}, {transform_indices = @transform_1, window_bounds = array<i64: 1, 128>}, {pipeline_mode = #tpu.pipeline_mode<synchronous>, transform_indices = @transform_2, window_bounds = array<i64: 64, 10>}, {pipeline_mode = #tpu.pipeline_mode<synchronous>, transform_indices = @transform_3, window_bounds = array<i64: 64, 4>}, {pipeline_mode = #tpu.pipeline_mode<synchronous>, transform_indices = @transform_4, window_bounds = array<i64: 64, 1>}, {pipeline_mode = #tpu.pipeline_mode<synchronous>, transform_indices = @transform_5, window_bounds = array<i64: 64, 64>}, {pipeline_mode = #tpu.pipeline_mode<synchronous>, transform_indices = @transform_6, window_bounds = array<i64: 64, 1>}, {pipeline_mode = #tpu.pipeline_mode<synchronous>, transform_indices = @transform_7, window_bounds = array<i64: 64, 64>}, {pipeline_mode = #tpu.pipeline_mode<synchronous>, transform_indices = @transform_8, window_bounds = array<i64: 64, 1>}, {pipeline_mode = #tpu.pipeline_mode<synchronous>, transform_indices = @transform_9, window_bounds = array<i64: 1, 64>}, {pipeline_mode = #tpu.pipeline_mode<synchronous>, transform_indices = @transform_10, window_bounds = array<i64: 1, 1>}, {transform_indices = @transform_11, window_bounds = array<i64: 1, 128>}]} {
    %c0 = arith.constant 0 : index
    %c0_0 = arith.constant 0 : index
    %0 = vector.load %arg1[%c0, %c0_0] : memref<128x10xf32, #tpu.memory_space<vmem>>, vector<128x10xf32>
    %1 = tpu.iota {dimensions = array<i32: 0>} : vector<4x128xi32>
    %c0_1 = arith.constant 0 : index
    %c0_2 = arith.constant 0 : index
    %2 = vector.load %arg2[%c0_1, %c0_2] : memref<1x128xi32, #tpu.memory_space<vmem>>, vector<1x128xi32>
    %3 = vector.broadcast %2 : vector<1x128xi32> to vector<4x128xi32>
    %4 = arith.cmpi eq, %1, %3 : vector<4x128xi32>
    %5 = arith.extui %4 : vector<4x128xi1> to vector<4x128xi32>
    %6 = arith.sitofp %5 : vector<4x128xi32> to vector<4x128xf32>
    %c0_3 = arith.constant 0 : index
    %c0_4 = arith.constant 0 : index
    %7 = vector.load %arg3[%c0_3, %c0_4] : memref<64x10xf32, #tpu.memory_space<vmem>>, vector<64x10xf32>
    %cst = arith.constant dense<0.000000e+00> : vector<64x128xf32>
    %8 = tpu.matmul %7, %0, %cst {dimension_numbers = #tpu.dot_dimension_numbers<[1], [1], [0], [0], [0, 0, 1, 0], [], []>} : vector<64x10xf32>, vector<128x10xf32>, vector<64x128xf32> -> vector<64x128xf32>
    %c0_5 = arith.constant 0 : index
    %c0_6 = arith.constant 0 : index
    %9 = vector.load %arg4[%c0_5, %c0_6] : memref<64x4xf32, #tpu.memory_space<vmem>>, vector<64x4xf32>
    %cst_7 = arith.constant dense<0.000000e+00> : vector<64x128xf32>
    %10 = tpu.matmul %9, %6, %cst_7 {dimension_numbers = #tpu.dot_dimension_numbers<[1], [0], [0], [1], [0, 0, 1, 1], [], []>} : vector<64x4xf32>, vector<4x128xf32>, vector<64x128xf32> -> vector<64x128xf32>
    %11 = arith.addf %8, %10 : vector<64x128xf32>
    %c0_8 = arith.constant 0 : index
    %c0_9 = arith.constant 0 : index
    %12 = vector.load %arg5[%c0_8, %c0_9] : memref<64x1xf32, #tpu.memory_space<vmem>>, vector<64x1xf32>
    %13 = vector.broadcast %12 : vector<64x1xf32> to vector<64x128xf32>
    %14 = arith.addf %11, %13 : vector<64x128xf32>
    %cst_10 = arith.constant 0.000000e+00 : f32
    %15 = vector.broadcast %cst_10 : f32 to vector<64x128xf32>
    %16 = arith.maximumf %14, %15 : vector<64x128xf32>
    %c0_11 = arith.constant 0 : index
    %c0_12 = arith.constant 0 : index
    %17 = vector.load %arg6[%c0_11, %c0_12] : memref<64x64xf32, #tpu.memory_space<vmem>>, vector<64x64xf32>
    %cst_13 = arith.constant dense<0.000000e+00> : vector<64x128xf32>
    %18 = tpu.matmul %17, %16, %cst_13 {dimension_numbers = #tpu.dot_dimension_numbers<[1], [0], [0], [1], [0, 0, 1, 1], [], []>} : vector<64x64xf32>, vector<64x128xf32>, vector<64x128xf32> -> vector<64x128xf32>
    %c0_14 = arith.constant 0 : index
    %c0_15 = arith.constant 0 : index
    %19 = vector.load %arg7[%c0_14, %c0_15] : memref<64x1xf32, #tpu.memory_space<vmem>>, vector<64x1xf32>
    %20 = vector.broadcast %19 : vector<64x1xf32> to vector<64x128xf32>
    %21 = arith.addf %18, %20 : vector<64x128xf32>
    %cst_16 = arith.constant 0.000000e+00 : f32
    %22 = vector.broadcast %cst_16 : f32 to vector<64x128xf32>
    %23 = arith.maximumf %21, %22 : vector<64x128xf32>
    %c0_17 = arith.constant 0 : index
    %c0_18 = arith.constant 0 : index
    %24 = vector.load %arg8[%c0_17, %c0_18] : memref<64x64xf32, #tpu.memory_space<vmem>>, vector<64x64xf32>
    %cst_19 = arith.constant dense<0.000000e+00> : vector<64x128xf32>
    %25 = tpu.matmul %24, %23, %cst_19 {dimension_numbers = #tpu.dot_dimension_numbers<[1], [0], [0], [1], [0, 0, 1, 1], [], []>} : vector<64x64xf32>, vector<64x128xf32>, vector<64x128xf32> -> vector<64x128xf32>
    %c0_20 = arith.constant 0 : index
    %c0_21 = arith.constant 0 : index
    %26 = vector.load %arg9[%c0_20, %c0_21] : memref<64x1xf32, #tpu.memory_space<vmem>>, vector<64x1xf32>
    %27 = vector.broadcast %26 : vector<64x1xf32> to vector<64x128xf32>
    %28 = arith.addf %25, %27 : vector<64x128xf32>
    %cst_22 = arith.constant 0.000000e+00 : f32
    %29 = vector.broadcast %cst_22 : f32 to vector<64x128xf32>
    %30 = arith.maximumf %28, %29 : vector<64x128xf32>
    %c0_23 = arith.constant 0 : index
    %c0_24 = arith.constant 0 : index
    %31 = vector.load %arg10[%c0_23, %c0_24] : memref<1x64xf32, #tpu.memory_space<vmem>>, vector<1x64xf32>
    %cst_25 = arith.constant dense<0.000000e+00> : vector<1x128xf32>
    %32 = tpu.matmul %31, %30, %cst_25 {dimension_numbers = #tpu.dot_dimension_numbers<[1], [0], [0], [1], [0, 0, 1, 1], [], []>} : vector<1x64xf32>, vector<64x128xf32>, vector<1x128xf32> -> vector<1x128xf32>
    %c0_26 = arith.constant 0 : index
    %c0_27 = arith.constant 0 : index
    %33 = vector.load %arg11[%c0_26, %c0_27] : memref<1x1xf32, #tpu.memory_space<vmem>>, vector<1x1xf32>
    %34 = vector.broadcast %33 : vector<1x1xf32> to vector<1x128xf32>
    %35 = arith.addf %32, %34 : vector<1x128xf32>
    %c0_28 = arith.constant 0 : index
    %c0_29 = arith.constant 0 : index
    %36 = vector.load %arg12[%c0_28, %c0_29] : memref<1x128xf32, #tpu.memory_space<vmem>>, vector<1x128xf32>
    tpu.vector_store %arg12[%c0_28, %c0_29], %35 {strides = array<i32>} : memref<1x128xf32, #tpu.memory_space<vmem>>, vector<1x128xf32>,
    return
  }
  func.func @transform_0(%arg0: i32) -> (i32, i32) {
    %c0_i32 = arith.constant 0 : i32
    %c0_i32_0 = arith.constant 0 : i32
    return %arg0, %c0_i32 : i32, i32
  }
  func.func @transform_1(%arg0: i32) -> (i32, i32) {
    %c0_i32 = arith.constant 0 : i32
    %c0_i32_0 = arith.constant 0 : i32
    return %c0_i32, %arg0 : i32, i32
  }
  func.func @transform_2(%arg0: i32) -> (i32, i32) {
    %c0_i32 = arith.constant 0 : i32
    %c0_i32_0 = arith.constant 0 : i32
    %c0_i32_1 = arith.constant 0 : i32
    return %c0_i32, %c0_i32_0 : i32, i32
  }
  func.func @transform_3(%arg0: i32) -> (i32, i32) {
    %c0_i32 = arith.constant 0 : i32
    %c0_i32_0 = arith.constant 0 : i32
    %c0_i32_1 = arith.constant 0 : i32
    return %c0_i32, %c0_i32_0 : i32, i32
  }
  func.func @transform_4(%arg0: i32) -> (i32, i32) {
    %c0_i32 = arith.constant 0 : i32
    %c0_i32_0 = arith.constant 0 : i32
    %c0_i32_1 = arith.constant 0 : i32
    return %c0_i32, %c0_i32_0 : i32, i32
  }
  func.func @transform_5(%arg0: i32) -> (i32, i32) {
    %c0_i32 = arith.constant 0 : i32
    %c0_i32_0 = arith.constant 0 : i32
    %c0_i32_1 = arith.constant 0 : i32
    return %c0_i32, %c0_i32_0 : i32, i32
  }
  func.func @transform_6(%arg0: i32) -> (i32, i32) {
    %c0_i32 = arith.constant 0 : i32
    %c0_i32_0 = arith.constant 0 : i32
    %c0_i32_1 = arith.constant 0 : i32
    return %c0_i32, %c0_i32_0 : i32, i32
  }
  func.func @transform_7(%arg0: i32) -> (i32, i32) {
    %c0_i32 = arith.constant 0 : i32
    %c0_i32_0 = arith.constant 0 : i32
    %c0_i32_1 = arith.constant 0 : i32
    return %c0_i32, %c0_i32_0 : i32, i32
  }
  func.func @transform_8(%arg0: i32) -> (i32, i32) {
    %c0_i32 = arith.constant 0 : i32
    %c0_i32_0 = arith.constant 0 : i32
    %c0_i32_1 = arith.constant 0 : i32
    return %c0_i32, %c0_i32_0 : i32, i32
  }
  func.func @transform_9(%arg0: i32) -> (i32, i32) {
    %c0_i32 = arith.constant 0 : i32
    %c0_i32_0 = arith.constant 0 : i32
    %c0_i32_1 = arith.constant 0 : i32
    return %c0_i32, %c0_i32_0 : i32, i32
  }
  func.func @transform_10(%arg0: i32) -> (i32, i32) {
    %c0_i32 = arith.constant 0 : i32
    %c0_i32_0 = arith.constant 0 : i32
    %c0_i32_1 = arith.constant 0 : i32
    return %c0_i32, %c0_i32_0 : i32, i32
  }
  func.func @transform_11(%arg0: i32) -> (i32, i32) {
    %c0_i32 = arith.constant 0 : i32
    %c0_i32_0 = arith.constant 0 : i32
    return %c0_i32, %arg0 : i32, i32
  }
}

</mosaic_0001>

<bundles_post_ra>
// kernel: tpu_custom_call.1
= control target key start
LH: loop header
LB: loop body
LE: loop exit
PB: predicated region body
PF: predicated region fallthrough
CT: control target
= control target key end

     0   :  { %s1091_s0 = inlined_call_operand.vmem [shape: f32[128,10], index: 0, kind: input, shape index: {}]   ;;  %s1092_s1 = inlined_call_operand.vmem [shape: s32[1,128], index: 1, kind: input, shape index: {}]   ;;  %s1093_s2 = inlined_call_operand.vmem [shape: f32[64,10], index: 2, kind: input, shape index: {}]   ;;  %s1094_s3 = inlined_call_operand.vmem [shape: f32[64,4], index: 3, kind: input, shape index: {}]   ;;  %s1095_s4 = inlined_call_operand.vmem [shape: f32[64,1], index: 4, kind: input, shape index: {}]   ;;  %s1096_s5 = inlined_call_operand.vmem [shape: f32[64,64], index: 5, kind: input, shape index: {}]   ;;  %s1097_s6 = inlined_call_operand.vmem [shape: f32[64,1], index: 6, kind: input, shape index: {}]   ;;  %s1098_s7 = inlined_call_operand.vmem [shape: f32[64,64], index: 7, kind: input, shape index: {}]   ;;  %s1099_s8 = inlined_call_operand.vmem [shape: f32[64,1], index: 8, kind: input, shape index: {}]   ;;  %s1100_s9 = inlined_call_operand.vmem [shape: f32[1,64], index: 9, kind: input, shape index: {}]   ;;  %s1101_s10 = inlined_call_operand.<no memory space> [shape: f32[1,1], index: 10, kind: input, shape index: {}]   ;;  %s1102_s11 = inlined_call_operand.hbm [shape: f32[1,128], index: 11, kind: output, shape index: {}]  }
   0x1   :  { %v16_v0 = vstv %s1101_s10 }
   0x2   :  { %17 = vst [vmem:[#allocation2] sm:$0x1] %v16_v0 }
   0x3   :  { %v56_v1 = vld [vmem:[%s1091_s0 + $0x78] sm:$0xff]  ;;  %vm150_vm0 = vcmask 80896   ;;  %v57_v2 = vlaneseq  ;;  %v708_v3 = vld [vmem:[%s1092_s1] ss:$0 sm:$0xff]  ;;  %v55_v4 = vld [vmem:[%s1091_s0 + $0x70] sm:$0xff]  ;;  %vm105_vm1 = vcmask 1043456  }
   0x4   :  { %686 = vmatpush.xpose.msk.msra.mxu1 %vm150_vm0, %v56_v1  ;;  %v735_v6 = vmov 0   ;;  %v72_v7 = vld [vmem:[%s1094_s3] sm:$0xff]  ;;  %vm80_vm3 = vcmask 31744   ;;  %v271_v8 = vld [vmem:[%s1095_s4 + $0x38] sm:$0xff]  ;;  %v736_v9 = vmov 0.0   ;;  %v54_v11 = vld [vmem:[%s1091_s0 + $0x68] sm:$0xff] }
   0x5   :  { %v58_v5 = vshrl.u32 %v57_v2, 7  ;;  %705 = vset.pattern.permute.xlu0 %v735_v6  ;;  %706 = vset.pattern.permute.xlu1 %v735_v6 }
   0x6   :  { %707 = vset.pattern.permute.xlu2 %v735_v6  ;;  %309 = vperm.xlu0 %705, %v271_v8  }
   0x7   :  { %vm61_vm2 = vcmp.eq.s32.totalorder %v58_v5, %v708_v3 }
   0x8   :  { %687 = vmatpush.xpose.msk.msra.mxu1 %vm150_vm0, %v55_v4  ;;  %v635_v10 = vsel %vm61_vm2, 1.0, %v736_v9 }
   0x9   :  { %636 = vmatpush.msk.msra.mxu0 %vm105_vm1, %v635_v10 }
   0xa   :  { %18 = vsyncpa [#allocation4], 0  ;;  %637 = vmatmul.msk.f32.vlgmr.msra.gmra.mxu0 %vm80_vm3, %v72_v7  ;;  %v269_v12 = vld [vmem:[%s1095_s4 + $0x28] sm:$0xff]  ;;  %v53_v13 = vld [vmem:[%s1091_s0 + $0x60] sm:$0xff]  ;;  %vm384_vm4 = vcmask 523264   ;;  %s626_s26 = sshll.u32 %s1102_s11, 4  ;;  %s627_s26 = int_to_ptr.hbm [resolvable:$true] %s626_s26 }
   0xb   :  { %645 = vmatpush.xpose.msk.msrb.mxu0 %vm150_vm0, %v56_v1  ;;  %v270_v14 = vld [vmem:[%s1095_s4 + $0x30] sm:$0xff]  ;;  %299 = vperm.xlu1 %706, %v269_v12   ;;  %v73_v15 = vld [vmem:[%s1094_s3 + $0x8] sm:$0xff]  ;;  %v52_v16 = vld [vmem:[%s1091_s0 + $0x58] sm:$0xff] }
   0xc   :  { %688 = vmatpush.xpose.msk.msra.mxu1 %vm150_vm0, %v54_v11  ;;  %v268_v17 = vld [vmem:[%s1095_s4 + $0x20] sm:$0xff]  ;;  %v51_v18 = vld [vmem:[%s1091_s0 + $0x50] sm:$0xff]  ;;  %v265_v19 = vld [vmem:[%s1095_s4 + $0x8] sm:$0xff] }
   0xd   :  { %v74_v20 = vld [vmem:[%s1094_s3 + $0x10] sm:$0xff]  ;;  %v50_v21 = vld [vmem:[%s1091_s0 + $0x48] sm:$0xff]  ;;  %v264_v22 = vld [vmem:[%s1095_s4] sm:$0xff] }
   0xe   :  { %304 = vperm.xlu0 %705, %v270_v14   ;;  %v49_v23 = vld [vmem:[%s1091_s0 + $0x40] sm:$0xff]  ;;  %v342_v24 = vld [vmem:[%s1097_s6 + $0x30] sm:$0xff]  ;;  %v75_v25 = vld [vmem:[%s1094_s3 + $0x18] sm:$0xff] }
   0xf   :  { %646 = vmatpush.xpose.msk.msrb.mxu0 %vm150_vm0, %v55_v4  ;;  %v48_v26 = vld [vmem:[%s1091_s0 + $0x38] sm:$0xff]  ;;  %v341_v27 = vld [vmem:[%s1097_s6 + $0x28] sm:$0xff]  ;;  %v47_v28 = vld [vmem:[%s1091_s0 + $0x30] sm:$0xff] }
  0x10   :  { %689 = vmatpush.xpose.msk.msra.mxu1 %vm150_vm0, %v53_v13  ;;  %v339_v29 = vld [vmem:[%s1097_s6 + $0x18] sm:$0xff]  ;;  %v76_v30 = vld [vmem:[%s1094_s3 + $0x20] sm:$0xff]  ;;  %v46_v32 = vld [vmem:[%s1091_s0 + $0x28] sm:$0xff] }
  0x11   :  { %v267_v31 = vld [vmem:[%s1095_s4 + $0x18] sm:$0xff]  ;;  %v338_v33 = vld [vmem:[%s1097_s6 + $0x10] sm:$0xff]  ;;  %v45_v34 = vld [vmem:[%s1091_s0 + $0x20] sm:$0xff] }
  0x12   :  { %638 = vmatmul.msk.f32.gmra.mxu0 %vm80_vm3, %v73_v15  ;;  %289 = vperm.xlu2 %707, %v267_v31   ;;  %v336_v35 = vld [vmem:[%s1097_s6] sm:$0xff]  ;;  %v266_v36 = vld [vmem:[%s1095_s4 + $0x10] sm:$0xff]  ;;  %v77_v37 = vld [vmem:[%s1094_s3 + $0x28] sm:$0xff] }
  0x13   :  { %647 = vmatpush.xpose.msk.msrb.mxu0 %vm150_vm0, %v54_v11  ;;  %294 = vperm.xlu1 %706, %v268_v17   ;;  %v44_v38 = vld [vmem:[%s1091_s0 + $0x18] sm:$0xff]  ;;  %v43_v40 = vld [vmem:[%s1091_s0 + $0x10] sm:$0xff]  ;;  %v471_v41 = vld [vmem:[%s1099_s8 + $0x28] sm:$0xff] }
  0x14   :  { %690 = vmatpush.xpose.msk.msra.mxu1 %vm150_vm0, %v52_v16  ;;  %v473_v39 = vld [vmem:[%s1099_s8 + $0x38] sm:$0xff]  ;;  %v78_v43 = vld [vmem:[%s1094_s3 + $0x30] sm:$0xff]  ;;  %v42_v44 = vld [vmem:[%s1091_s0 + $0x8] sm:$0xff] }
  0x15   :  { %v343_v42 = vld [vmem:[%s1097_s6 + $0x38] sm:$0xff]  ;;  %v470_v45 = vld [vmem:[%s1099_s8 + $0x20] sm:$0xff]  ;;  %v468_v47 = vld [vmem:[%s1099_s8 + $0x10] sm:$0xff] }
  0x16   :  { %279 = vperm.xlu0 %705, %v265_v19   ;;  %v41_v46 = vld [vmem:[%s1091_s0] sm:$0xff]  ;;  %v79_v49 = vld [vmem:[%s1094_s3 + $0x38] sm:$0xff]  ;;  %v467_v51 = vld [vmem:[%s1099_s8 + $0x8] sm:$0xff]  ;;  %s737_s3 = smov [#allocation3]  }
  0x17   :  { %648 = vmatpush.xpose.msk.msrb.mxu0 %vm150_vm0, %v53_v13  ;;  %v340_v48 = vld [vmem:[%s1097_s6 + $0x20] sm:$0xff]  ;;  %v337_v53 = vld [vmem:[%s1097_s6 + $0x8] sm:$0xff]  ;;  %v472_v56 = vld [vmem:[%s1099_s8 + $0x30] sm:$0xff]  ;;  %s624_s24 = sshll.u32 %s737_s3, 4  ;;  %s625_s24 = int_to_ptr.vmem [resolvable:$true] %s624_s24 }
  0x18   :  { %691 = vmatpush.xpose.msk.msra.mxu1 %vm150_vm0, %v51_v18  ;;  %v68_v50 = vld [vmem:[%s1093_s2 + $0x20] sm:$0xff]  ;;  %v69_v55 = vld [vmem:[%s1093_s2 + $0x28] sm:$0xff]  ;;  %v70_v58 = vld [vmem:[%s1093_s2 + $0x30] sm:$0xff] }
  0x19   :  { %v588_v52 = vld [vmem:[#allocation2] sm:$0x1]  ;;  %v65_v57 = vld [vmem:[%s1093_s2 + $0x8] sm:$0xff]  ;;  %v469_v59 = vld [vmem:[%s1099_s8 + $0x18] sm:$0xff] }
  0x1a   :  { %639 = vmatmul.msk.f32.gmra.mxu0 %vm80_vm3, %v74_v20  ;;  %284 = vperm.xlu2 %707, %v266_v36   ;;  %v64_v54 = vld [vmem:[%s1093_s2] sm:$0xff]  ;;  %v66_v60 = vld [vmem:[%s1093_s2 + $0x10] sm:$0xff]  ;;  %v71_v61 = vld [vmem:[%s1093_s2 + $0x38] sm:$0xff] }
  0x1b   :  { %649 = vmatpush.xpose.msk.msrb.mxu0 %vm150_vm0, %v52_v16  ;;  %274 = vperm.xlu1 %706, %v264_v22   ;;  %v466_v62 = vld [vmem:[%s1099_s8] sm:$0xff]  ;;  %v67_v63 = vld [vmem:[%s1093_s2 + $0x18] sm:$0xff] }
  0x1c   :  { %692 = vmatpush.xpose.msk.msra.mxu1 %vm150_vm0, %v50_v21 }
  0x1e   :  { %376 = vperm.xlu0 %705, %v342_v24  }
  0x1f   :  { %650 = vmatpush.xpose.msk.msrb.mxu0 %vm150_vm0, %v51_v18 }
  0x20   :  { %693 = vmatpush.xpose.msk.msra.mxu1 %vm150_vm0, %v49_v23 }
  0x22   :  { %640 = vmatmul.msk.f32.gmra.mxu0 %vm80_vm3, %v75_v25  ;;  %381 = vperm.xlu2 %707, %v343_v42  }
  0x23   :  { %651 = vmatpush.xpose.msk.msrb.mxu0 %vm150_vm0, %v50_v21  ;;  %371 = vperm.xlu1 %706, %v341_v27  }
  0x24   :  { %694 = vmatpush.xpose.msk.msra.mxu1 %vm150_vm0, %v48_v26 }
  0x26   :  { %361 = vperm.xlu0 %705, %v339_v29  }
  0x27   :  { %652 = vmatpush.xpose.msk.msrb.mxu0 %vm150_vm0, %v49_v23 }
  0x28   :  { %695 = vmatpush.xpose.msk.msra.mxu1 %vm150_vm0, %v47_v28 }
  0x2a   :  { %641 = vmatmul.msk.f32.gmra.mxu0 %vm80_vm3, %v76_v30  ;;  %366 = vperm.xlu2 %707, %v340_v48   ;;  %v328_v48 = vld [vmem:[%s1096_s5] sm:$0xff] }
  0x2b   :  { %653 = vmatpush.xpose.msk.msrb.mxu0 %vm150_vm0, %v48_v26  ;;  %356 = vperm.xlu1 %706, %v338_v33  }
  0x2c   :  { %696 = vmatpush.xpose.msk.msra.mxu1 %vm150_vm0, %v46_v32 }
  0x2e   :  { %346 = vperm.xlu0 %705, %v336_v35  }
  0x2f   :  { %654 = vmatpush.xpose.msk.msrb.mxu0 %vm150_vm0, %v47_v28 }
  0x30   :  { %697 = vmatpush.xpose.msk.msra.mxu1 %vm150_vm0, %v45_v34 }
  0x32   :  { %642 = vmatmul.msk.f32.gmra.mxu0 %vm80_vm3, %v77_v37  ;;  %351 = vperm.xlu2 %707, %v337_v53   ;;  %v333_v53 = vld [vmem:[%s1096_s5 + $0x28] sm:$0xff] }
  0x33   :  { %655 = vmatpush.xpose.msk.msrb.mxu0 %vm150_vm0, %v46_v32  ;;  %511 = vperm.xlu1 %706, %v473_v39  }
  0x34   :  { %698 = vmatpush.xpose.msk.msra.mxu1 %vm150_vm0, %v44_v38 }
  0x36   :  { %501 = vperm.xlu0 %705, %v471_v41  }
  0x37   :  { %656 = vmatpush.xpose.msk.msrb.mxu0 %vm150_vm0, %v45_v34 }
  0x38   :  { %699 = vmatpush.xpose.msk.msra.mxu1 %vm150_vm0, %v43_v40 }
  0x3a   :  { %643 = vmatmul.msk.f32.gmra.mxu0 %vm80_vm3, %v78_v43  ;;  %506 = vperm.xlu2 %707, %v472_v56  }
  0x3b   :  { %657 = vmatpush.xpose.msk.msrb.mxu0 %vm150_vm0, %v44_v38  ;;  %496 = vperm.xlu1 %706, %v470_v45  }
  0x3c   :  { %700 = vmatpush.xpose.msk.msra.mxu1 %vm150_vm0, %v42_v44 }
  0x3e   :  { %486 = vperm.xlu0 %705, %v468_v47  }
  0x3f   :  { %658 = vmatpush.xpose.msk.msrb.mxu0 %vm150_vm0, %v43_v40 }
  0x40   :  { %701 = vmatpush.xpose.msk.msra.mxu1 %vm150_vm0, %v41_v46 }
  0x42   :  { %644 = vmatmul.msk.f32.gmra.mxu0 %vm80_vm3, %v79_v49  ;;  %491 = vperm.xlu2 %707, %v469_v59   ;;  %v329_v49 = vld [vmem:[%s1096_s5 + $0x8] sm:$0xff] }
  0x43   :  { %659 = vmatpush.xpose.msk.msrb.mxu0 %vm150_vm0, %v42_v44  ;;  %665 = vmatmul.msk.f32.vlgmr.msra.gmra.mxu1 %vm150_vm0, %v68_v50  ;;  %v330_v50 = vld [vmem:[%s1096_s5 + $0x10] sm:$0xff] }
  0x44   :  { %481 = vperm.xlu1 %706, %v467_v51   ;;  %v331_v51 = vld [vmem:[%s1096_s5 + $0x18] sm:$0xff] }
  0x46   :  { %591 = vperm.xlu0 %705, %v588_v52   ;;  %v332_v52 = vld [vmem:[%s1096_s5 + $0x20] sm:$0xff] }
  0x47   :  { %660 = vmatpush.xpose.msk.msrb.mxu0 %vm150_vm0, %v41_v46 }
  0x4a   :  { %661 = vmatmul.msk.f32.vlgmr.msrb.gmra.mxu0 %vm150_vm0, %v64_v54  ;;  %476 = vperm.xlu2 %707, %v466_v62   ;;  %v334_v54 = vld [vmem:[%s1096_s5 + $0x30] sm:$0xff] }
  0x4b   :  { %666 = vmatmul.msk.f32.gmra.mxu1 %vm150_vm0, %v69_v55  ;;  %v335_v55 = vld [vmem:[%s1096_s5 + $0x38] sm:$0xff] }
  0x52   :  { %662 = vmatmul.msk.f32.gmra.mxu0 %vm150_vm0, %v65_v57 }
  0x53   :  { %667 = vmatmul.msk.f32.gmra.mxu1 %vm150_vm0, %v70_v58 }
  0x5a   :  { %663 = vmatmul.msk.f32.gmra.mxu0 %vm150_vm0, %v66_v60 }
  0x5b   :  { %668 = vmatmul.msk.f32.gmra.mxu1 %vm150_vm0, %v71_v61 }
  0x62   :  { %664 = vmatmul.msk.f32.gmra.mxu0 %vm150_vm0, %v67_v63 }
  0x6c   :  { %v290_v17 = vpop.permute.xlu2 %289 }
  0x74   :  { %v285_v35 = vpop.permute.xlu2 %284 }
  0x78   :  { %v310_v12 = vpop.permute.xlu0 %309 }
  0x7c   :  { %v382_v62 = vpop.permute.xlu2 %381 }
  0x7d   :  { %v300_v14 = vpop.permute.xlu1 %299 }
  0x80   :  { %v305_v21 = vpop.permute.xlu0 %304 }
  0x85   :  { %v295_v25 = vpop.permute.xlu1 %294 }
  0x87   :  { %v126_v0 = vpop.f32.mrf.mxu0 }
  0x88   :  { %v280_v40 = vpop.permute.xlu0 %279 }
  0x8d   :  { %v275_v43 = vpop.permute.xlu1 %274 }
  0x8f   :  { %v129_v1 = vpop.f32.mrf.mxu0 }
  0x90   :  { %v377_v63 = vpop.permute.xlu0 %376 }
  0x97   :  { %v132_v2 = vpop.f32.mrf.mxu0 }
  0x9f   :  { %v135_v3 = vpop.f32.mrf.mxu0 }
  0xa7   :  { %v138_v4 = vpop.f32.mrf.mxu0 }
  0xaf   :  { %v141_v5 = vpop.f32.mrf.mxu0 }
  0xb7   :  { %v144_v6 = vpop.f32.mrf.mxu0 }
  0xbf   :  { %v147_v7 = vpop.f32.mrf.mxu0 }
  0xc0   :  { %v252_v8 = vpop.f32.mrf.mxu1 }
  0xc1   :  { %v253_v22 = vadd.f32 %v252_v8, %v138_v4 }
  0xc3   :  { %v316_v31 = vadd.f32 %v295_v25, %v253_v22  ;;  %v459_v25 = vld [vmem:[%s1098_s7 + $0x8] sm:$0xff] }
  0xc5   :  { %v324_v38 = vmax.f32 %v316_v31, 0.0  ;;  %v465_v31 = vld [vmem:[%s1098_s7 + $0x38] sm:$0xff] }
  0xc7   :  { %v240_v9 = vpop.f32.mrf.mxu0 }
  0xc8   :  { %v255_v10 = vpop.f32.mrf.mxu1  ;;  %v241_v37 = vadd.f32 %v240_v9, %v126_v0 }
  0xc9   :  { %v256_v19 = vadd.f32 %v255_v10, %v141_v5 }
  0xca   :  { %v312_v45 = vadd.f32 %v275_v43, %v241_v37 }
  0xcb   :  { %v317_v27 = vadd.f32 %v300_v14, %v256_v19 }
  0xcc   :  { %v320_v47 = vmax.f32 %v312_v45, 0.0 }
  0xcd   :  { %v325_v34 = vmax.f32 %v317_v27, 0.0  ;;  %v461_v27 = vld [vmem:[%s1098_s7 + $0x18] sm:$0xff] }
  0xcf   :  { %v243_v11 = vpop.f32.mrf.mxu0 }
  0xd0   :  { %v258_v13 = vpop.f32.mrf.mxu1  ;;  %v244_v33 = vadd.f32 %v243_v11, %v129_v1  ;;  %v372_v1 = vpop.permute.xlu1 %371 }
  0xd1   :  { %v259_v15 = vadd.f32 %v258_v13, %v144_v6  ;;  %v362_v6 = vpop.permute.xlu0 %361 }
  0xd2   :  { %v313_v42 = vadd.f32 %v280_v40, %v244_v33 }
  0xd3   :  { %v318_v24 = vadd.f32 %v305_v21, %v259_v15 }
  0xd4   :  { %v321_v46 = vmax.f32 %v313_v42, 0.0 }
  0xd5   :  { %v326_v30 = vmax.f32 %v318_v24, 0.0  ;;  %v458_v24 = vld [vmem:[%s1098_s7] sm:$0xff] }
  0xd7   :  { %v246_v16 = vpop.f32.mrf.mxu0 }
  0xd8   :  { %v261_v18 = vpop.f32.mrf.mxu1  ;;  %v247_v28 = vadd.f32 %v246_v16, %v132_v2  ;;  %v367_v2 = vpop.permute.xlu2 %366 }
  0xd9   :  { %v262_v20 = vadd.f32 %v261_v18, %v147_v7  ;;  %v357_v13 = vpop.permute.xlu1 %356  ;;  %v347_v19 = vpop.permute.xlu0 %346 }
  0xda   :  { %v314_v39 = vadd.f32 %v285_v35, %v247_v28  ;;  %v462_v28 = vld [vmem:[%s1098_s7 + $0x20] sm:$0xff] }
  0xdb   :  { %v319_v23 = vadd.f32 %v310_v12, %v262_v20 }
  0xdc   :  { %v322_v44 = vmax.f32 %v314_v39, 0.0 }
  0xdd   :  { %v327_v26 = vmax.f32 %v319_v23, 0.0 }
  0xdf   :  { %v249_v29 = vpop.f32.mrf.mxu0  ;;  %417 = vmatpush.msra.mxu2 %v327_v26  ;;  %v460_v26 = vld [vmem:[%s1098_s7 + $0x10] sm:$0xff] }
  0xe0   :  { %v250_v32 = vadd.f32 %v249_v29, %v135_v3  ;;  %v352_v16 = vpop.permute.xlu2 %351  ;;  %v463_v29 = vld [vmem:[%s1098_s7 + $0x28] sm:$0xff] }
  0xe1   :  { %418 = vmatpush.msra.mxu2 %v326_v30  ;;  %v464_v30 = vld [vmem:[%s1098_s7 + $0x30] sm:$0xff] }
  0xe2   :  { %v315_v36 = vadd.f32 %v290_v17, %v250_v32 }
  0xe3   :  { %419 = vmatpush.msra.mxu2 %v325_v34 }
  0xe4   :  { %v323_v41 = vmax.f32 %v315_v36, 0.0 }
  0xe5   :  { %420 = vmatpush.msra.mxu2 %v324_v38  ;;  %v512_v38 = vpop.permute.xlu1 %511 }
  0xe7   :  { %421 = vmatpush.msra.mxu2 %v323_v41  ;;  %v502_v41 = vpop.permute.xlu0 %501 }
  0xe8   :  { %v507_v39 = vpop.permute.xlu2 %506 }
  0xe9   :  { %422 = vmatpush.msra.mxu2 %v322_v44 }
  0xeb   :  { %423 = vmatpush.msra.mxu2 %v321_v46 }
  0xed   :  { %424 = vmatpush.msra.mxu2 %v320_v47  ;;  %v497_v42 = vpop.permute.xlu1 %496 }
  0xee   :  { %669 = vmatmul.msk.f32.vlgmr.msra.gmra.mxu2 %vm384_vm4, %v328_v48 }
  0xf0   :  { %v492_v46 = vpop.permute.xlu2 %491 }
  0xf6   :  { %670 = vmatmul.msk.f32.gmra.mxu2 %vm384_vm4, %v329_v49 }
  0xfe   :  { %671 = vmatmul.msk.f32.gmra.mxu2 %vm384_vm4, %v330_v50 }
 0x106   :  { %672 = vmatmul.msk.f32.gmra.mxu2 %vm384_vm4, %v331_v51 }
 0x10e   :  { %673 = vmatmul.msk.f32.gmra.mxu2 %vm384_vm4, %v332_v52 }
 0x116   :  { %674 = vmatmul.msk.f32.gmra.mxu2 %vm384_vm4, %v333_v53  ;;  %v487_v53 = vpop.permute.xlu0 %486 }
 0x11e   :  { %675 = vmatmul.msk.f32.gmra.mxu2 %vm384_vm4, %v334_v54 }
 0x126   :  { %676 = vmatmul.msk.f32.gmra.mxu2 %vm384_vm4, %v335_v55 }
 0x171   :  { %v426_v56 = vpop.f32.mrf.mxu2 }
 0x172   :  { %v427_v20 = vadd.f32 %v426_v56, %v347_v19  ;;  %v482_v56 = vpop.permute.xlu1 %481 }
 0x174   :  { %v450_v23 = vmax.f32 %v427_v20, 0.0 }
 0x179   :  { %v429_v57 = vpop.f32.mrf.mxu2 }
 0x17a   :  { %v430_v17 = vadd.f32 %v429_v57, %v352_v16 }
 0x17c   :  { %v451_v22 = vmax.f32 %v430_v17, 0.0 }
 0x181   :  { %v432_v58 = vpop.f32.mrf.mxu2 }
 0x182   :  { %v433_v14 = vadd.f32 %v432_v58, %v357_v13 }
 0x184   :  { %v452_v21 = vmax.f32 %v433_v14, 0.0 }
 0x189   :  { %v435_v59 = vpop.f32.mrf.mxu2 }
 0x18a   :  { %v436_v11 = vadd.f32 %v435_v59, %v362_v6  ;;  %v477_v59 = vpop.permute.xlu2 %476 }
 0x18c   :  { %v453_v18 = vmax.f32 %v436_v11, 0.0 }
 0x191   :  { %v438_v60 = vpop.f32.mrf.mxu2 }
 0x192   :  { %v439_v9 = vadd.f32 %v438_v60, %v367_v2 }
 0x194   :  { %v454_v15 = vmax.f32 %v439_v9, 0.0 }
 0x199   :  { %v441_v61 = vpop.f32.mrf.mxu2 }
 0x19a   :  { %v442_v7 = vadd.f32 %v441_v61, %v372_v1  ;;  %v592_v1 = vpop.permute.xlu0 %591 }
 0x19b   :  { %v594_v2 = vperm.slane %v592_v1, 0 }
 0x19c   :  { %v455_v12 = vmax.f32 %v442_v7, 0.0 }
 0x1a1   :  { %v444_v0 = vpop.f32.mrf.mxu2 }
 0x1a2   :  { %v445_v4 = vadd.f32 %v444_v0, %v377_v63  ;;  %v587_v0 = vld [vmem:[%s1100_s9] sm:$0x1] }
 0x1a4   :  { %v456_v10 = vmax.f32 %v445_v4, 0.0 }
 0x1a9   :  { %v447_v3 = vpop.f32.mrf.mxu2 }
 0x1aa   :  { %v448_v5 = vadd.f32 %v447_v3, %v382_v62 }
 0x1ac   :  { %v457_v8 = vmax.f32 %v448_v5, 0.0 }
 0x1ae   :  { %546 = vmatpush.msra.mxu3 %v457_v8 }
 0x1b0   :  { %547 = vmatpush.msra.mxu3 %v456_v10 }
 0x1b2   :  { %548 = vmatpush.msra.mxu3 %v455_v12 }
 0x1b4   :  { %549 = vmatpush.msra.mxu3 %v454_v15 }
 0x1b6   :  { %550 = vmatpush.msra.mxu3 %v453_v18 }
 0x1b8   :  { %551 = vmatpush.msra.mxu3 %v452_v21 }
 0x1ba   :  { %552 = vmatpush.msra.mxu3 %v451_v22 }
 0x1bc   :  { %553 = vmatpush.msra.mxu3 %v450_v23 }
 0x1bd   :  { %677 = vmatmul.msk.f32.vlgmr.msra.gmra.mxu3 %vm384_vm4, %v458_v24 }
 0x1c5   :  { %678 = vmatmul.msk.f32.gmra.mxu3 %vm384_vm4, %v459_v25 }
 0x1cd   :  { %679 = vmatmul.msk.f32.gmra.mxu3 %vm384_vm4, %v460_v26 }
 0x1d5   :  { %680 = vmatmul.msk.f32.gmra.mxu3 %vm384_vm4, %v461_v27 }
 0x1dd   :  { %681 = vmatmul.msk.f32.gmra.mxu3 %vm384_vm4, %v462_v28 }
 0x1e5   :  { %682 = vmatmul.msk.f32.gmra.mxu3 %vm384_vm4, %v463_v29 }
 0x1ed   :  { %683 = vmatmul.msk.f32.gmra.mxu3 %vm384_vm4, %v464_v30 }
 0x1f5   :  { %684 = vmatmul.msk.f32.gmra.mxu3 %vm384_vm4, %v465_v31 }
 0x240   :  { %v555_v32 = vpop.f32.mrf.mxu3 }
 0x241   :  { %v556_v60 = vadd.f32 %v555_v32, %v477_v59 }
 0x243   :  { %v579_v63 = vmax.f32 %v556_v60, 0.0 }
 0x248   :  { %v558_v33 = vpop.f32.mrf.mxu3 }
 0x249   :  { %v559_v57 = vadd.f32 %v558_v33, %v482_v56 }
 0x24b   :  { %v580_v62 = vmax.f32 %v559_v57, 0.0 }
 0x250   :  { %v561_v34 = vpop.f32.mrf.mxu3 }
 0x251   :  { %v562_v54 = vadd.f32 %v561_v34, %v487_v53 }
 0x253   :  { %v581_v61 = vmax.f32 %v562_v54, 0.0 }
 0x258   :  { %v564_v35 = vpop.f32.mrf.mxu3 }
 0x259   :  { %v565_v51 = vadd.f32 %v564_v35, %v492_v46 }
 0x25b   :  { %v582_v58 = vmax.f32 %v565_v51, 0.0 }
 0x260   :  { %v567_v36 = vpop.f32.mrf.mxu3 }
 0x261   :  { %v568_v49 = vadd.f32 %v567_v36, %v497_v42 }
 0x263   :  { %v583_v55 = vmax.f32 %v568_v49, 0.0 }
 0x268   :  { %v570_v37 = vpop.f32.mrf.mxu3 }
 0x269   :  { %v571_v47 = vadd.f32 %v570_v37, %v502_v41 }
 0x26b   :  { %v584_v52 = vmax.f32 %v571_v47, 0.0 }
 0x270   :  { %v573_v40 = vpop.f32.mrf.mxu3 }
 0x271   :  { %v574_v44 = vadd.f32 %v573_v40, %v507_v39 }
 0x273   :  { %v585_v50 = vmax.f32 %v574_v44, 0.0 }
 0x278   :  { %v576_v43 = vpop.f32.mrf.mxu3 }
 0x279   :  { %v577_v45 = vadd.f32 %v576_v43, %v512_v38 }
 0x27b   :  { %v586_v48 = vmax.f32 %v577_v45, 0.0 }
 0x27d   :  { %606 = vmatpush.msrb.mxu2 %v586_v48 }
 0x27f   :  { %607 = vmatpush.msrb.mxu2 %v585_v50 }
 0x281   :  { %608 = vmatpush.msrb.mxu2 %v584_v52 }
 0x283   :  { %609 = vmatpush.msrb.mxu2 %v583_v55 }
 0x285   :  { %610 = vmatpush.msrb.mxu2 %v582_v58 }
 0x287   :  { %611 = vmatpush.msrb.mxu2 %v581_v61 }
 0x289   :  { %612 = vmatpush.msrb.mxu2 %v580_v62 }
 0x28b   :  { %613 = vmatpush.msrb.mxu2 %v579_v63 }
 0x28c   :  { %685 = vmatmul.msk.f32.vlgmr.msrb.gmra.mxu2 %vm384_vm4, %v587_v0 }
 0x30f   :  { %v615_v3 = vpop.f32.mrf.mxu2 }
 0x310   :  { %v616_v4 = vadd.f32 %v615_v3, %v594_v2 }
 0x312   :  { %618 = vst [vmem:[#allocation3] sm:$0x1] %v616_v4 }
 0x313   :  { %629 = dma.vmem_to_hbm [thread:$0]  %s625_s24, 16, %s627_s26, [#allocation4]  }
 0x314   :  { %733 = dma.done.wait [#allocation4], 16  }
 0x315   :  { %734 = vsyncadd [#allocation4], 4294967280 }
 0x316   :  { %634 = vsyncpa [#allocation4], 1 }

</bundles_post_ra>
